<compile_context>
chip_gen: v6e
topology: v6e:2x2x1
jax: 0.10.0
libtpu: 0.0.40
codegen_flags: <defaults>
</compile_context>

<pallas_src>
import functools

import jax
import jax.numpy as jnp
import numpy as np
from jax.experimental import pallas as pl
from jax.experimental.pallas import tpu as pltpu

H1 = 300          # fc1 out features (torch)
H2 = 400          # fc2 out features (torch)
H1P = 384         # padded (multiple of 128)
H2P = 512         # padded (multiple of 128)


def _round_up(x, m):
    return ((x + m - 1) // m) * m


def _pad2d(x, rows, cols):
    r, c = x.shape
    return jnp.pad(x, ((0, rows - r), (0, cols - c)))


def critic_kernel(obs_ref, act_ref,
                  w1_ref, b1_ref,
                  w2a_ref, w2b_ref, b2_ref,
                  w3_ref, b3_ref,
                  out_ref):
    # fc1 + relu   (bf16 MXU inputs, f32 accumulate, f32 elementwise)
    x1 = jnp.dot(obs_ref[...], w1_ref[...],
                 preferred_element_type=jnp.float32) + b1_ref[...]
    x1 = jnp.maximum(x1, 0.0).astype(jnp.bfloat16)

    # fc2 over concat([x1, actions]) == x1 @ W2a + actions @ W2b + b2, then relu
    x2 = (jnp.dot(x1, w2a_ref[...], preferred_element_type=jnp.float32)
          + jnp.dot(act_ref[...], w2b_ref[...], preferred_element_type=jnp.float32)
          + b2_ref[...])
    x2 = jnp.maximum(x2, 0.0).astype(jnp.bfloat16)

    # fc3 (lane-dense padded output; padded columns are exactly 0)
    out_ref[...] = (jnp.dot(x2, w3_ref[...], preferred_element_type=jnp.float32)
                    + b3_ref[...])


def prepare_critic_params(params, n_states, n_actions):
    """One-time prep: transpose torch-layout (out,in) weights to (in,out),
    split W2 for the concat fusion, zero-pad to lane-aligned shapes, cast
    matmul operands to bf16.  Padded bias entries are exactly zero (required
    for correctness of the padding trick)."""
    w1, b1, w2, b2, w3, b3 = (params["w1"], params["b1"], params["w2"],
                              params["b2"], params["w3"], params["b3"])
    n_out_pad = _round_up(max(n_actions, 1), 128)

    w1_t = _pad2d(w1.T, n_states, H1P).astype(jnp.bfloat16)          # (n_states, 384)
    b1_p = _pad2d(b1.reshape(1, -1), 1, H1P).astype(jnp.float32)     # (1, 384)

    w2_t = w2.T                                                      # (300+na, 400)
    w2a = _pad2d(w2_t[:H1, :], H1P, H2P).astype(jnp.bfloat16)        # (384, 512)
    w2b = _pad2d(w2_t[H1:, :], n_actions, H2P).astype(jnp.bfloat16)  # (na, 512)
    b2_p = _pad2d(b2.reshape(1, -1), 1, H2P).astype(jnp.float32)     # (1, 512)

    w3_t = _pad2d(w3.T, H2P, n_out_pad).astype(jnp.bfloat16)         # (512, n_out_pad)
    b3_p = _pad2d(b3.reshape(1, -1), 1, n_out_pad).astype(jnp.float32)

    return dict(w1_t=w1_t, b1=b1_p, w2a=w2a, w2b=w2b, b2=b2_p,
                w3_t=w3_t, b3=b3_p, n_actions=n_actions)


@functools.partial(jax.jit, static_argnames=("tb",))
def critic_forward(observation, actions, prepped, *, tb=256):
    """observation: (B, n_states) f32, actions: (B, n_actions) f32.
    Returns (B, n_actions) f32."""
    B, n_states = observation.shape
    n_actions = actions.shape[1]
    n_out_pad = prepped["w3_t"].shape[1]

    # Batch tile: >=8 sublanes; cap at `tb` for large batches.
    TB = min(tb, _round_up(B, 8))
    B_pad = _round_up(B, TB)

    obs = jnp.pad(observation.astype(jnp.bfloat16), ((0, B_pad - B), (0, 0)))
    act = jnp.pad(actions.astype(jnp.bfloat16), ((0, B_pad - B), (0, 0)))

    grid = (B_pad // TB,)
    batch_map = lambda i: (i, 0)
    const_map = lambda i: (0, 0)   # weights/biases stay resident across the grid

    in_specs = [
        pl.BlockSpec((TB, n_states), batch_map),
        pl.BlockSpec((TB, n_actions), batch_map),
        pl.BlockSpec(prepped["w1_t"].shape, const_map),
        pl.BlockSpec(prepped["b1"].shape, const_map),
        pl.BlockSpec(prepped["w2a"].shape, const_map),
        pl.BlockSpec(prepped["w2b"].shape, const_map),
        pl.BlockSpec(prepped["b2"].shape, const_map),
        pl.BlockSpec(prepped["w3_t"].shape, const_map),
        pl.BlockSpec(prepped["b3"].shape, const_map),
    ]
    out_specs = pl.BlockSpec((TB, n_out_pad), batch_map)

    flops = 2 * B_pad * (n_states * H1P + H1P * H2P + n_actions * H2P
                         + H2P * n_out_pad)
    weight_bytes = sum(int(np.prod(prepped[k].shape)) * prepped[k].dtype.itemsize
                       for k in ("w1_t", "b1", "w2a", "w2b", "b2", "w3_t", "b3"))
    bytes_accessed = (obs.size + act.size) * 2 + weight_bytes + B_pad * n_out_pad * 4

    out = pl.pallas_call(
        critic_kernel,
        out_shape=jax.ShapeDtypeStruct((B_pad, n_out_pad), jnp.float32),
        grid=grid,
        in_specs=in_specs,
        out_specs=out_specs,
        compiler_params=pltpu.CompilerParams(
            dimension_semantics=("parallel",),
            vmem_limit_bytes=32 * 1024 * 1024),
        cost_estimate=pl.CostEstimate(flops=flops, transcendentals=0,
                                      bytes_accessed=bytes_accessed),
    )(obs, act,
      prepped["w1_t"], prepped["b1"],
      prepped["w2a"], prepped["w2b"], prepped["b2"],
      prepped["w3_t"], prepped["b3"])

    return out[:B, :n_actions]


# --------------------------- parameter construction ---------------------------

def fanin_init(key, size, fanin=None):
    """Matches Agents/Networks.fanin_init: U(-1/sqrt(fanin), 1/sqrt(fanin)),
    fanin defaults to size[0]."""
    fanin = fanin or size[0]
    v = 1.0 / np.sqrt(fanin)
    return jax.random.uniform(key, size, jnp.float32, -v, v)


def make_params(key, n_states, n_actions, init_w=0.003):
    ks = jax.random.split(key, 6)
    # torch nn.Linear weight layout: (out_features, in_features)
    w1 = fanin_init(ks[0], (H1, n_states))
    w2 = fanin_init(ks[1], (H2, H1 + n_actions))
    w3 = jax.random.uniform(ks[2], (n_actions, H2), jnp.float32, -init_w, init_w)
    # biases keep torch default Linear init: U(-1/sqrt(in), 1/sqrt(in))
    b1 = jax.random.uniform(ks[3], (H1,), jnp.float32,
                            -1.0 / np.sqrt(n_states), 1.0 / np.sqrt(n_states))
    b2 = jax.random.uniform(ks[4], (H2,), jnp.float32,
                            -1.0 / np.sqrt(H1 + n_actions), 1.0 / np.sqrt(H1 + n_actions))
    b3 = jax.random.uniform(ks[5], (n_actions,), jnp.float32,
                            -1.0 / np.sqrt(H2), 1.0 / np.sqrt(H2))
    return dict(w1=w1, b1=b1, w2=w2, b2=b2, w3=w3, b3=b3)


def critic_forward_ref(observation, actions, p):
    x = jnp.maximum(observation @ p["w1"].T + p["b1"], 0.0)
    x = jnp.concatenate([x, actions], axis=1)
    x = jnp.maximum(x @ p["w2"].T + p["b2"], 0.0)
    return x @ p["w3"].T + p["b3"]


if __name__ == "__main__":
    key = jax.random.PRNGKey(0)
    k_obs, k_act, k_params = jax.random.split(key, 3)

    B, n_states, n_actions = 2, 8, 4
    observation = jax.random.normal(k_obs, (B, n_states), jnp.float32)
    actions = jax.random.normal(k_act, (B, n_actions), jnp.float32)
    params = make_params(k_params, n_states, n_actions)

    # One-time parameter prep (transpose / split / pad / bf16 cast).
    prepped = prepare_critic_params(params, n_states, n_actions)

    out = critic_forward(observation, actions, prepped)
    out = jax.block_until_ready(out)

    ref = critic_forward_ref(observation, actions, params)
    # bf16 MXU inputs with f32 accumulation -> loose-but-safe tolerance vs f32 ref.
    np.testing.assert_allclose(np.asarray(out), np.asarray(ref),
                               rtol=5e-2, atol=5e-3)
    assert out.shape == (B, n_actions)
    print("KERNEL_OK")
</pallas_src>

<mosaic_0001>
module attributes {stable_mosaic.version = 11 : i64} {
  func.func @critic_kernel(%arg0: i32, %arg1: memref<8x8xbf16, #tpu.memory_space<vmem>>, %arg2: memref<8x4xbf16, #tpu.memory_space<vmem>>, %arg3: memref<8x384xbf16, #tpu.memory_space<vmem>>, %arg4: memref<1x384xf32, #tpu.memory_space<vmem>>, %arg5: memref<384x512xbf16, #tpu.memory_space<vmem>>, %arg6: memref<4x512xbf16, #tpu.memory_space<vmem>>, %arg7: memref<1x512xf32, #tpu.memory_space<vmem>>, %arg8: memref<512x128xbf16, #tpu.memory_space<vmem>>, %arg9: memref<1x128xf32, #tpu.memory_space<vmem>>, %arg10: memref<8x128xf32, #tpu.memory_space<vmem>>) attributes {dimension_semantics = [#tpu.dimension_semantics<parallel>], iteration_bounds = array<i64: 1>, scalar_prefetch = 0 : i64, scratch_operands = 0 : i64, tpu.core_type = #tpu.core_type<tc>, window_params = [{transform_indices = @transform_0, window_bounds = array<i64: 8, 8>}, {transform_indices = @transform_1, window_bounds = array<i64: 8, 4>}, {pipeline_mode = #tpu.pipeline_mode<synchronous>, transform_indices = @transform_2, window_bounds = array<i64: 8, 384>}, {pipeline_mode = #tpu.pipeline_mode<synchronous>, transform_indices = @transform_3, window_bounds = array<i64: 1, 384>}, {pipeline_mode = #tpu.pipeline_mode<synchronous>, transform_indices = @transform_4, window_bounds = array<i64: 384, 512>}, {pipeline_mode = #tpu.pipeline_mode<synchronous>, transform_indices = @transform_5, window_bounds = array<i64: 4, 512>}, {pipeline_mode = #tpu.pipeline_mode<synchronous>, transform_indices = @transform_6, window_bounds = array<i64: 1, 512>}, {pipeline_mode = #tpu.pipeline_mode<synchronous>, transform_indices = @transform_7, window_bounds = array<i64: 512, 128>}, {pipeline_mode = #tpu.pipeline_mode<synchronous>, transform_indices = @transform_8, window_bounds = array<i64: 1, 128>}, {transform_indices = @transform_9, window_bounds = array<i64: 8, 128>}]} {
    %c0 = arith.constant 0 : index
    %c0_0 = arith.constant 0 : index
    %0 = vector.load %arg1[%c0, %c0_0] : memref<8x8xbf16, #tpu.memory_space<vmem>>, vector<8x8xbf16>
    %c0_1 = arith.constant 0 : index
    %c0_2 = arith.constant 0 : index
    %1 = vector.load %arg3[%c0_1, %c0_2] : memref<8x384xbf16, #tpu.memory_space<vmem>>, vector<8x384xbf16>
    %cst = arith.constant dense<0.000000e+00> : vector<8x384xf32>
    %2 = tpu.matmul %0, %1, %cst {dimension_numbers = #tpu.dot_dimension_numbers<[1], [0], [0], [1], [0, 0, 1, 1], [], []>} : vector<8x8xbf16>, vector<8x384xbf16>, vector<8x384xf32> -> vector<8x384xf32>
    %c0_3 = arith.constant 0 : index
    %c0_4 = arith.constant 0 : index
    %3 = vector.load %arg4[%c0_3, %c0_4] : memref<1x384xf32, #tpu.memory_space<vmem>>, vector<1x384xf32>
    %4 = vector.broadcast %3 : vector<1x384xf32> to vector<8x384xf32>
    %5 = arith.addf %2, %4 : vector<8x384xf32>
    %cst_5 = arith.constant 0.000000e+00 : f32
    %6 = vector.broadcast %cst_5 : f32 to vector<8x384xf32>
    %7 = arith.maximumf %5, %6 : vector<8x384xf32>
    %8 = arith.truncf %7 : vector<8x384xf32> to vector<8x384xbf16>
    %c0_6 = arith.constant 0 : index
    %c0_7 = arith.constant 0 : index
    %9 = vector.load %arg5[%c0_6, %c0_7] : memref<384x512xbf16, #tpu.memory_space<vmem>>, vector<384x512xbf16>
    %cst_8 = arith.constant dense<0.000000e+00> : vector<8x512xf32>
    %10 = tpu.matmul %8, %9, %cst_8 {dimension_numbers = #tpu.dot_dimension_numbers<[1], [0], [0], [1], [0, 0, 1, 1], [], []>} : vector<8x384xbf16>, vector<384x512xbf16>, vector<8x512xf32> -> vector<8x512xf32>
    %c0_9 = arith.constant 0 : index
    %c0_10 = arith.constant 0 : index
    %11 = vector.load %arg2[%c0_9, %c0_10] : memref<8x4xbf16, #tpu.memory_space<vmem>>, vector<8x4xbf16>
    %c0_11 = arith.constant 0 : index
    %c0_12 = arith.constant 0 : index
    %12 = vector.load %arg6[%c0_11, %c0_12] : memref<4x512xbf16, #tpu.memory_space<vmem>>, vector<4x512xbf16>
    %cst_13 = arith.constant dense<0.000000e+00> : vector<8x512xf32>
    %13 = tpu.matmul %11, %12, %cst_13 {dimension_numbers = #tpu.dot_dimension_numbers<[1], [0], [0], [1], [0, 0, 1, 1], [], []>} : vector<8x4xbf16>, vector<4x512xbf16>, vector<8x512xf32> -> vector<8x512xf32>
    %14 = arith.addf %10, %13 : vector<8x512xf32>
    %c0_14 = arith.constant 0 : index
    %c0_15 = arith.constant 0 : index
    %15 = vector.load %arg7[%c0_14, %c0_15] : memref<1x512xf32, #tpu.memory_space<vmem>>, vector<1x512xf32>
    %16 = vector.broadcast %15 : vector<1x512xf32> to vector<8x512xf32>
    %17 = arith.addf %14, %16 : vector<8x512xf32>
    %cst_16 = arith.constant 0.000000e+00 : f32
    %18 = vector.broadcast %cst_16 : f32 to vector<8x512xf32>
    %19 = arith.maximumf %17, %18 : vector<8x512xf32>
    %20 = arith.truncf %19 : vector<8x512xf32> to vector<8x512xbf16>
    %c0_17 = arith.constant 0 : index
    %c0_18 = arith.constant 0 : index
    %21 = vector.load %arg8[%c0_17, %c0_18] : memref<512x128xbf16, #tpu.memory_space<vmem>>, vector<512x128xbf16>
    %cst_19 = arith.constant dense<0.000000e+00> : vector<8x128xf32>
    %22 = tpu.matmul %20, %21, %cst_19 {dimension_numbers = #tpu.dot_dimension_numbers<[1], [0], [0], [1], [0, 0, 1, 1], [], []>} : vector<8x512xbf16>, vector<512x128xbf16>, vector<8x128xf32> -> vector<8x128xf32>
    %c0_20 = arith.constant 0 : index
    %c0_21 = arith.constant 0 : index
    %23 = vector.load %arg9[%c0_20, %c0_21] : memref<1x128xf32, #tpu.memory_space<vmem>>, vector<1x128xf32>
    %24 = vector.broadcast %23 : vector<1x128xf32> to vector<8x128xf32>
    %25 = arith.addf %22, %24 : vector<8x128xf32>
    %c0_22 = arith.constant 0 : index
    %c0_23 = arith.constant 0 : index
    %26 = vector.load %arg10[%c0_22, %c0_23] : memref<8x128xf32, #tpu.memory_space<vmem>>, vector<8x128xf32>
    tpu.vector_store %arg10[%c0_22, %c0_23], %25 {strides = array<i32>} : memref<8x128xf32, #tpu.memory_space<vmem>>, vector<8x128xf32>,
    return
  }
  func.func @transform_0(%arg0: i32) -> (i32, i32) {
    %c0_i32 = arith.constant 0 : i32
    %c0_i32_0 = arith.constant 0 : i32
    return %arg0, %c0_i32 : i32, i32
  }
  func.func @transform_1(%arg0: i32) -> (i32, i32) {
    %c0_i32 = arith.constant 0 : i32
    %c0_i32_0 = arith.constant 0 : i32
    return %arg0, %c0_i32 : i32, i32
  }
  func.func @transform_2(%arg0: i32) -> (i32, i32) {
    %c0_i32 = arith.constant 0 : i32
    %c0_i32_0 = arith.constant 0 : i32
    %c0_i32_1 = arith.constant 0 : i32
    return %c0_i32, %c0_i32_0 : i32, i32
  }
  func.func @transform_3(%arg0: i32) -> (i32, i32) {
    %c0_i32 = arith.constant 0 : i32
    %c0_i32_0 = arith.constant 0 : i32
    %c0_i32_1 = arith.constant 0 : i32
    return %c0_i32, %c0_i32_0 : i32, i32
  }
  func.func @transform_4(%arg0: i32) -> (i32, i32) {
    %c0_i32 = arith.constant 0 : i32
    %c0_i32_0 = arith.constant 0 : i32
    %c0_i32_1 = arith.constant 0 : i32
    return %c0_i32, %c0_i32_0 : i32, i32
  }
  func.func @transform_5(%arg0: i32) -> (i32, i32) {
    %c0_i32 = arith.constant 0 : i32
    %c0_i32_0 = arith.constant 0 : i32
    %c0_i32_1 = arith.constant 0 : i32
    return %c0_i32, %c0_i32_0 : i32, i32
  }
  func.func @transform_6(%arg0: i32) -> (i32, i32) {
    %c0_i32 = arith.constant 0 : i32
    %c0_i32_0 = arith.constant 0 : i32
    %c0_i32_1 = arith.constant 0 : i32
    return %c0_i32, %c0_i32_0 : i32, i32
  }
  func.func @transform_7(%arg0: i32) -> (i32, i32) {
    %c0_i32 = arith.constant 0 : i32
    %c0_i32_0 = arith.constant 0 : i32
    %c0_i32_1 = arith.constant 0 : i32
    return %c0_i32, %c0_i32_0 : i32, i32
  }
  func.func @transform_8(%arg0: i32) -> (i32, i32) {
    %c0_i32 = arith.constant 0 : i32
    %c0_i32_0 = arith.constant 0 : i32
    %c0_i32_1 = arith.constant 0 : i32
    return %c0_i32, %c0_i32_0 : i32, i32
  }
  func.func @transform_9(%arg0: i32) -> (i32, i32) {
    %c0_i32 = arith.constant 0 : i32
    %c0_i32_0 = arith.constant 0 : i32
    return %arg0, %c0_i32 : i32, i32
  }
}

</mosaic_0001>

<bundles_post_ra>
// kernel: critic_forward.1
= control target key start
LH: loop header
LB: loop body
LE: loop exit
PB: predicated region body
PF: predicated region fallthrough
CT: control target
= control target key end

     0   :  { %14 = vsyncpa [#allocation3], 0  ;;  %s2032_s0 = inlined_call_operand.vmem [shape: bf16[8,8], index: 0, kind: input, shape index: {}]   ;;  %s2033_s1 = inlined_call_operand.vmem [shape: bf16[8,4], index: 1, kind: input, shape index: {}]   ;;  %s2034_s2 = inlined_call_operand.vmem [shape: bf16[8,384], index: 2, kind: input, shape index: {}]   ;;  %s2035_s3 = inlined_call_operand.vmem [shape: f32[1,384], index: 3, kind: input, shape index: {}]   ;;  %s2036_s4 = inlined_call_operand.hbm [shape: bf16[384,512], index: 4, kind: input, shape index: {}]   ;;  %s2037_s5 = inlined_call_operand.vmem [shape: bf16[4,512], index: 5, kind: input, shape index: {}]   ;;  %s2038_s6 = inlined_call_operand.hbm [shape: f32[1,512], index: 6, kind: input, shape index: {}]   ;;  %s2039_s7 = inlined_call_operand.hbm [shape: bf16[512,128], index: 7, kind: input, shape index: {}]   ;;  %s2040_s8 = inlined_call_operand.vmem [shape: f32[1,128], index: 8, kind: input, shape index: {}]   ;;  %s2041_s9 = inlined_call_operand.vmem [shape: f32[8,128], index: 9, kind: output, shape index: {}]  }
   0x1   :  { %15 = vsyncpa [#allocation5], 0  ;;  %s1890_s30 = smov [#allocation4]   ;;  %s1891_s11 = smov [#allocation2]  }
   0x2   :  { %s44_s10 = sshll.u32 %s1890_s30, 4  ;;  %s29_s12 = sshll.u32 %s1891_s11, 4  ;;  %s45_s10 = int_to_ptr.vmem [resolvable:$true] %s44_s10  ;;  %s30_s12 = int_to_ptr.vmem [resolvable:$true] %s29_s12 }
   0x3   :  { %s1834_s13 = scalar_lea.vmem %s45_s10, 64  ;;  %p1839_p1 = scmp.lt.s32.totalorder %s45_s10, %s45_s10 }
   0x4   :  { %p1835_p0 = scmp.ne.s32.totalorder %s45_s10, %s1834_s13  ;;  %p1840_p2 = scmp.lt.s32.totalorder %s1834_s13, %s1834_s13 }
   0x6   :  { %p1841_p3 = por %p1840_p2, %p1839_p1 }
   0x8   :  { %p1842_p4 = pnand %p1841_p3, %p1835_p0 }
   0xa   :  { %1845 = shalt.err (!%p1842_p4)
}
   0xb   :  { %47 = dma.hbm_to_vmem [thread:$0]  %s2038_s6, 64, %s45_s10, [#allocation5]  }
   0xc   :  { %s1854_s16 = scalar_lea.vmem %s30_s12, 12288  ;;  %p1859_p6 = scmp.lt.s32.totalorder %s30_s12, %s30_s12 }
   0xd   :  { %p1855_p5 = scmp.ne.s32.totalorder %s30_s12, %s1854_s16  ;;  %p1860_p7 = scmp.lt.s32.totalorder %s1854_s16, %s1854_s16 }
   0xf   :  { %p1861_p8 = por %p1860_p7, %p1859_p6 }
  0x11   :  { %p1862_p9 = pnand %p1861_p8, %p1855_p5 }
  0x13   :  { %1865 = shalt.err (!%p1862_p9)
}
  0x14   :  { %s1892_s17 = smov 256   ;;  %s1893_s18 = smov 16  }
  0x15   :  { %35 = dma.hbm_to_vmem [thread:$0]  %s2036_s4, 12288, %s30_s12, [#allocation3], %s1892_s17, %s1892_s17, %s1893_s18  }
  0x16   :  { %s1894_s21 = smov [#allocation6]  }
  0x17   :  { %s53_s22 = sshll.u32 %s1894_s21, 4  ;;  %s54_s22 = int_to_ptr.vmem [resolvable:$true] %s53_s22 }
  0x18   :  { %s1874_s23 = scalar_lea.vmem %s54_s22, 4096  ;;  %p1879_p11 = scmp.lt.s32.totalorder %s54_s22, %s54_s22 }
  0x19   :  { %p1875_p10 = scmp.ne.s32.totalorder %s54_s22, %s1874_s23  ;;  %p1880_p12 = scmp.lt.s32.totalorder %s1874_s23, %s1874_s23 }
  0x1b   :  { %p1881_p13 = por %p1880_p12, %p1879_p11 }
  0x1d   :  { %p1882_p0 = pnand %p1881_p13, %p1875_p10 }
  0x1f   :  { %1885 = shalt.err (!%p1882_p0)
}
  0x20   :  { %s1895_s6 = smov 64   ;;  %s1896_s24 = smov 4  }
  0x21   :  { %59 = dma.hbm_to_vmem [thread:$0]  %s2039_s7, 4096, %s54_s22, [#allocation5], %s1895_s6, %s1895_s6, %s1896_s24  }
  0x22   :  { %1886 = dma.done.wait [#allocation3], 12288  }
  0x23   :  { %1887 = vsyncadd [#allocation3], 4294955008 }
  0x24   :  { %1888 = dma.done.wait [#allocation5], 4160  }
  0x25   :  { %1889 = vsyncadd [#allocation5], 4294963136  ;;  %v1897_v0 = vmov 0.0   ;;  %v1898_v1 = vmov 0   ;;  %v77_v2 = vlaneseq  ;;  %vm1899_vm0 = vmmov 0   ;;  %v73_v8 = vld [vmem:[%s2034_s2] sm:$0xff] }
  0x26   :  { %1629 = vmatprep.subr.bf16.mxu1 %v1897_v0  ;;  %146 = vmatprep.mubr.bf16.mxu0 %v1898_v1  ;;  %v1900_v3 = vmov 1983009808   ;;  %vm104_vm1 = vcmask 1043456   ;;  %v1648_v9 = vld [vmem:[%s2034_s2 + $0x8] ss:$0 sps:$4 sm:$0xff]   ;;  %v1445_v10 = vcombine.high %v73_v8, %v73_v8  ;;  %v1444_v11 = vcombine.low %v73_v8, %v73_v8  ;;  %v298_v12 = vld [vmem:[%s2037_s5] sm:$0xff] }
  0x27   :  { %1631 = vmatprep.mubr.msk.bf16.mxu1 %vm1899_vm0, %v1897_v0  ;;  %v302_v4 = vunpack.c.l.s4 %v1900_v3  ;;  %v1961_v5 = vshrl.u32 %v77_v2, 7  ;;  %v112_v13 = vsel %vm104_vm1, %v1648_v9, 0  ;;  %vm321_vm2 = vcmask 1041408   ;;  %v72_v17 = vld [vmem:[%s2032_s0] sm:$0xf] }
  0x28   :  { %v300_v15 = vcombine.high %v298_v12, %v298_v12  ;;  %1447 = vmatprep.subr.msk.bf16.mxu0 %vm104_vm1, %v1445_v10  ;;  %v106_v16 = vsel %vm104_vm1, %v1444_v11, 0  ;;  %1630 = vmatpush3.bf16.msra.mxu1 %v112_v13  ;;  %vm100_vm3 = vcmask 64512   ;;  %v1651_v21 = vld [vmem:[#allocation2 + $0xe4] ss:$16 sps:$4 sm:$0xff]   ;;  %v1649_v24 = vld [vmem:[#allocation2 + $0xe0] ss:$16 sps:$4 sm:$0xff]  }
  0x29   :  { %v303_v6 = vunpack.c.0.s8 %v302_v4  ;;  %129 = vmatpush1.bf16.msra.mxu0 %v106_v16  ;;  %v297_v25 = vld [vmem:[%s2033_s1] sm:$0xf]  ;;  %vm317_vm4 = vcmask 31744   ;;  %v1654_v26 = vld [vmem:[#allocation2 + $0xc4] ss:$16 sps:$4 sm:$0xff]  }
  0x2a   :  { %v1674_v27 = vld [vmem:[#allocation2 + $0x2e0] ss:$16 sps:$4 sm:$0xff]   ;;  %v1676_v28 = vld [vmem:[#allocation2 + $0x2e4] ss:$16 sps:$4 sm:$0xff]   ;;  %v1724_v9 = vld [vmem:[#allocation2 + $0xec] ss:$16 sps:$4 sm:$0xff]  }
  0x2b   :  { %v306_v7 = vsub.s32 %v303_v6, %v1961_v5  ;;  %1632 = vmatmul.mubr.msk.bf16.vlgmr.msra.gmra.mxu1 %vm100_vm3, %v72_v17  ;;  %v1652_v29 = vld [vmem:[#allocation2 + $0xc0] ss:$16 sps:$4 sm:$0xff]   ;;  %v1682_v31 = vld [vmem:[#allocation2 + $0x2c4] ss:$16 sps:$4 sm:$0xff]   ;;  %v1727_v11 = vld [vmem:[#allocation2 + $0x2ec] ss:$16 sps:$4 sm:$0xff]  }
  0x2c   :  { %1448 = vmatmul.mubr.msk.bf16.vlgmr.msra.gmra.mxu0 %vm100_vm3, %v72_v17  ;;  %407 = vmatprep.mubr.bf16.mxu1 %v1898_v1  ;;  %v1680_v30 = vld [vmem:[#allocation2 + $0x2c0] ss:$16 sps:$4 sm:$0xff]   ;;  %v1657_v32 = vld [vmem:[#allocation2 + $0xa4] ss:$16 sps:$4 sm:$0xff]  }
  0x2d   :  { %v307_v14 = vrot.slane %v298_v12, %v306_v7  ;;  %v314_v19 = vrot.slane %v300_v15, %v306_v7  ;;  %366 = vmatprep.mubr.bf16.mxu0 %v1898_v1  ;;  %v1688_v33 = vld [vmem:[#allocation2 + $0x2a4] ss:$16 sps:$4 sm:$0xff]   ;;  %v1655_v34 = vld [vmem:[#allocation2 + $0xa0] ss:$16 sps:$4 sm:$0xff]   ;;  %v87_v12 = vsub.s32 2, %v1961_v5  ;;  %v83_v15 = vsub.s32 1, %v1961_v5 }
  0x2e   :  { %v1686_v35 = vld [vmem:[#allocation2 + $0x2a0] ss:$16 sps:$4 sm:$0xff]   ;;  %v1660_v36 = vld [vmem:[#allocation2 + $0x84] ss:$16 sps:$4 sm:$0xff]  }
  0x2f   :  { %v315_v18 = vcombine.high %v307_v14, %v307_v14  ;;  %v323_v20 = vsel %vm321_vm2, %v307_v14, 0  ;;  %v316_v22 = vcombine.high %v314_v19, %v314_v19  ;;  %v329_v23 = vsel %vm321_vm2, %v314_v19, 0  ;;  %v1694_v37 = vld [vmem:[#allocation2 + $0x284] ss:$16 sps:$4 sm:$0xff]   ;;  %v1658_v38 = vld [vmem:[#allocation2 + $0x80] ss:$16 sps:$4 sm:$0xff]  }
  0x30   :  { %v1692_v39 = vld [vmem:[#allocation2 + $0x280] ss:$16 sps:$4 sm:$0xff]   ;;  %v1663_v40 = vld [vmem:[#allocation2 + $0x64] ss:$16 sps:$4 sm:$0xff]   ;;  %v79_v14 = vsub.s32 0, %v1961_v5 }
  0x31   :  { %1450 = vmatprep.subr.msk.bf16.mxu0 %vm321_vm2, %v315_v18  ;;  %1452 = vmatprep.subr.msk.bf16.mxu1 %vm321_vm2, %v316_v22  ;;  %v1700_v41 = vld [vmem:[#allocation2 + $0x264] ss:$16 sps:$4 sm:$0xff]   ;;  %v1661_v42 = vld [vmem:[#allocation2 + $0x60] ss:$16 sps:$4 sm:$0xff]  }
  0x32   :  { %349 = vmatpush1.bf16.msra.mxu0 %v323_v20  ;;  %390 = vmatpush1.bf16.msra.mxu1 %v329_v23  ;;  %v1698_v43 = vld [vmem:[#allocation2 + $0x260] ss:$16 sps:$4 sm:$0xff]   ;;  %v1667_v44 = vld [vmem:[#allocation2 + $0x44] ss:$16 sps:$4 sm:$0xff]  }
  0x33   :  { %896 = vmatprep.subr.bf16.mxu0 %v1651_v21  ;;  %937 = vmatprep.subr.bf16.mxu1 %v1676_v28  ;;  %v1706_v45 = vld [vmem:[#allocation2 + $0x244] ss:$16 sps:$4 sm:$0xff]   ;;  %v1665_v46 = vld [vmem:[#allocation2 + $0x40] ss:$16 sps:$4 sm:$0xff]  }
  0x34   :  { %v1704_v47 = vld [vmem:[#allocation2 + $0x240] ss:$16 sps:$4 sm:$0xff]   ;;  %v1670_v48 = vld [vmem:[#allocation2 + $0x24] ss:$16 sps:$4 sm:$0xff]  }
  0x35   :  { %1453 = vmatmul.mubr.msk.bf16.vlgmr.msra.gmra.mxu1 %vm317_vm4, %v297_v25  ;;  %1451 = vmatmul.mubr.msk.bf16.vlgmr.msra.gmra.mxu0 %vm317_vm4, %v297_v25  ;;  %v1712_v49 = vld [vmem:[#allocation2 + $0x224] ss:$16 sps:$4 sm:$0xff]   ;;  %v1668_v50 = vld [vmem:[#allocation2 + $0x20] ss:$16 sps:$4 sm:$0xff]  }
  0x36   :  { %897 = vmatpush1.bf16.msra.mxu0 %v1649_v24  ;;  %938 = vmatpush1.bf16.msra.mxu1 %v1674_v27  ;;  %v1710_v51 = vld [vmem:[#allocation2 + $0x220] ss:$16 sps:$4 sm:$0xff]   ;;  %v1673_v52 = vld [vmem:[#allocation2 + $0x4] ss:$16 sps:$4 sm:$0xff]  }
  0x37   :  { %898 = vmatprep.subr.bf16.mxu0 %v1654_v26  ;;  %969 = vmatprep.mubr.bf16.mxu1 %v1898_v1  ;;  %v1671_v53 = vld [vmem:[#allocation2] ss:$16 sps:$4 sm:$0xff]   ;;  %v1679_v54 = vld [vmem:[#allocation2 + $0x1e4] ss:$16 sps:$4 sm:$0xff]  }
  0x38   :  { %939 = vmatprep.subr.bf16.mxu1 %v1682_v31  ;;  %v1677_v55 = vld [vmem:[#allocation2 + $0x1e0] ss:$16 sps:$4 sm:$0xff]   ;;  %v1685_v56 = vld [vmem:[#allocation2 + $0x1c4] ss:$16 sps:$4 sm:$0xff]   ;;  %v1730_v31 = vld [vmem:[#allocation2 + $0xcc] ss:$16 sps:$4 sm:$0xff]  }
  0x39   :  { %v1683_v57 = vld [vmem:[#allocation2 + $0x1c0] ss:$16 sps:$4 sm:$0xff]   ;;  %v1691_v58 = vld [vmem:[#allocation2 + $0x1a4] ss:$16 sps:$4 sm:$0xff]  }
  0x3a   :  { %899 = vmatpush1.bf16.msra.mxu0 %v1652_v29  ;;  %940 = vmatpush1.bf16.msra.mxu1 %v1680_v30  ;;  %v1689_v59 = vld [vmem:[#allocation2 + $0x1a0] ss:$16 sps:$4 sm:$0xff]   ;;  %v1697_v60 = vld [vmem:[#allocation2 + $0x184] ss:$16 sps:$4 sm:$0xff]   ;;  %v1722_v29 = vld [vmem:[#allocation2 + $0xe8] ss:$16 sps:$4 sm:$0xff]  }
  0x3b   :  { %900 = vmatprep.subr.bf16.mxu0 %v1657_v32  ;;  %941 = vmatprep.subr.bf16.mxu1 %v1688_v33  ;;  %v1695_v61 = vld [vmem:[#allocation2 + $0x180] ss:$16 sps:$4 sm:$0xff]   ;;  %v1703_v62 = vld [vmem:[#allocation2 + $0x164] ss:$16 sps:$4 sm:$0xff]  }
  0x3c   :  { %v1701_v63 = vld [vmem:[#allocation2 + $0x160] ss:$16 sps:$4 sm:$0xff]   ;;  %v1709_v0 = vld [vmem:[#allocation2 + $0x144] ss:$16 sps:$4 sm:$0xff]  }
  0x3d   :  { %v1707_v2 = vld [vmem:[#allocation2 + $0x140] ss:$16 sps:$4 sm:$0xff]   ;;  %v1715_v3 = vld [vmem:[#allocation2 + $0x124] ss:$16 sps:$4 sm:$0xff]  }
  0x3e   :  { %901 = vmatpush1.bf16.msra.mxu0 %v1655_v34  ;;  %942 = vmatpush1.bf16.msra.mxu1 %v1686_v35  ;;  %v1718_v4 = vld [vmem:[#allocation2 + $0x204] ss:$16 sps:$4 sm:$0xff]   ;;  %v1713_v6 = vld [vmem:[#allocation2 + $0x120] ss:$16 sps:$4 sm:$0xff]  }
  0x3f   :  { %902 = vmatprep.subr.bf16.mxu0 %v1660_v36  ;;  %943 = vmatprep.subr.bf16.mxu1 %v1694_v37  ;;  %v1716_v7 = vld [vmem:[#allocation2 + $0x200] ss:$16 sps:$4 sm:$0xff]   ;;  %v1721_v8 = vld [vmem:[#allocation2 + $0x104] ss:$16 sps:$4 sm:$0xff]  }
  0x40   :  { %v1719_v10 = vld [vmem:[#allocation2 + $0x100] ss:$16 sps:$4 sm:$0xff]  }
  0x41   :  { %v75_v13 = vld [vmem:[%s2035_s3] sm:$0x7] }
  0x42   :  { %903 = vmatpush1.bf16.msra.mxu0 %v1658_v38  ;;  %944 = vmatpush1.bf16.msra.mxu1 %v1692_v39  ;;  %v88_v16 = vrot.slane %v75_v13, %v87_v12  ;;  %v80_v17 = vrot.slane %v75_v13, %v79_v14  ;;  %v84_v19 = vrot.slane %v75_v13, %v83_v15  ;;  %v1725_v38 = vld [vmem:[#allocation2 + $0x2e8] ss:$16 sps:$4 sm:$0xff]  }
  0x43   :  { %904 = vmatprep.subr.bf16.mxu0 %v1663_v40  ;;  %945 = vmatprep.subr.bf16.mxu1 %v1700_v41  ;;  %v1728_v39 = vld [vmem:[#allocation2 + $0xc8] ss:$16 sps:$4 sm:$0xff]   ;;  %v1733_v41 = vld [vmem:[#allocation2 + $0x2cc] ss:$16 sps:$4 sm:$0xff]  }
  0x44   :  { %v1770_v13 = vld [vmem:[#allocation2 + $0x1e8] ss:$16 sps:$4 sm:$0xff]  }
  0x46   :  { %905 = vmatpush1.bf16.msra.mxu0 %v1661_v42  ;;  %946 = vmatpush1.bf16.msra.mxu1 %v1698_v43  ;;  %v1736_v42 = vld [vmem:[#allocation2 + $0xac] ss:$16 sps:$4 sm:$0xff]  }
  0x47   :  { %906 = vmatprep.subr.bf16.mxu0 %v1667_v44  ;;  %947 = vmatprep.subr.bf16.mxu1 %v1706_v45 }
  0x4a   :  { %907 = vmatpush1.bf16.msra.mxu0 %v1665_v46  ;;  %948 = vmatpush1.bf16.msra.mxu1 %v1704_v47  ;;  %v1731_v46 = vld [vmem:[#allocation2 + $0x2c8] ss:$16 sps:$4 sm:$0xff]  }
  0x4b   :  { %908 = vmatprep.subr.bf16.mxu0 %v1670_v48  ;;  %949 = vmatprep.subr.bf16.mxu1 %v1712_v49  ;;  %v1734_v47 = vld [vmem:[#allocation2 + $0xa8] ss:$16 sps:$4 sm:$0xff]   ;;  %v1739_v49 = vld [vmem:[#allocation2 + $0x2ac] ss:$16 sps:$4 sm:$0xff]  }
  0x4e   :  { %909 = vmatpush1.bf16.msra.mxu0 %v1668_v50  ;;  %950 = vmatpush1.bf16.msra.mxu1 %v1710_v51  ;;  %v1742_v50 = vld [vmem:[#allocation2 + $0x8c] ss:$16 sps:$4 sm:$0xff]  }
  0x4f   :  { %910 = vmatprep.subr.bf16.mxu0 %v1673_v52  ;;  %951 = vmatprep.subr.bf16.mxu1 %v1718_v4  ;;  %v1763_v4 = vld [vmem:[#allocation2 + $0x22c] ss:$16 sps:$4 sm:$0xff]  }
  0x52   :  { %911 = vmatpush1.bf16.msra.mxu0 %v1671_v53  ;;  %952 = vmatpush1.bf16.msra.mxu1 %v1716_v7  ;;  %v1761_v7 = vld [vmem:[#allocation2 + $0x228] ss:$16 sps:$4 sm:$0xff]  }
  0x53   :  { %912 = vmatprep.subr.bf16.mxu0 %v1679_v54  ;;  %978 = vmatprep.subr.bf16.mxu1 %v1724_v9  ;;  %v1737_v54 = vld [vmem:[#allocation2 + $0x2a8] ss:$16 sps:$4 sm:$0xff]   ;;  %v1769_v9 = vld [vmem:[#allocation2 + $0x20c] ss:$16 sps:$4 sm:$0xff]  }
  0x56   :  { %913 = vmatpush2.bf16.msra.mxu0 %v1677_v55  ;;  %v1740_v55 = vld [vmem:[#allocation2 + $0x88] ss:$16 sps:$4 sm:$0xff]  }
  0x57   :  { %914 = vmatprep.subr.bf16.mxu0 %v1685_v56  ;;  %v1745_v56 = vld [vmem:[#allocation2 + $0x28c] ss:$16 sps:$4 sm:$0xff]  }
  0x5a   :  { %915 = vmatpush2.bf16.msra.mxu0 %v1683_v57  ;;  %v1748_v57 = vld [vmem:[#allocation2 + $0x6c] ss:$16 sps:$4 sm:$0xff]  }
  0x5b   :  { %916 = vmatprep.subr.bf16.mxu0 %v1691_v58  ;;  %v1743_v58 = vld [vmem:[#allocation2 + $0x288] ss:$16 sps:$4 sm:$0xff]  }
  0x5e   :  { %917 = vmatpush2.bf16.msra.mxu0 %v1689_v59  ;;  %v1746_v59 = vld [vmem:[#allocation2 + $0x68] ss:$16 sps:$4 sm:$0xff]  }
  0x5f   :  { %918 = vmatprep.subr.bf16.mxu0 %v1697_v60  ;;  %v1751_v60 = vld [vmem:[#allocation2 + $0x26c] ss:$16 sps:$4 sm:$0xff]  }
  0x62   :  { %919 = vmatpush2.bf16.msra.mxu0 %v1695_v61  ;;  %v1754_v61 = vld [vmem:[#allocation2 + $0x4c] ss:$16 sps:$4 sm:$0xff]  }
  0x63   :  { %920 = vmatprep.subr.bf16.mxu0 %v1703_v62  ;;  %v1752_v62 = vld [vmem:[#allocation2 + $0x48] ss:$16 sps:$4 sm:$0xff]  }
  0x66   :  { %921 = vmatpush2.bf16.msra.mxu0 %v1701_v63  ;;  %v1757_v63 = vld [vmem:[#allocation2 + $0x24c] ss:$16 sps:$4 sm:$0xff]  }
  0x67   :  { %922 = vmatprep.subr.bf16.mxu0 %v1709_v0  ;;  %v1760_v0 = vld [vmem:[#allocation2 + $0x2c] ss:$16 sps:$4 sm:$0xff]  }
  0x6a   :  { %923 = vmatpush2.bf16.msra.mxu0 %v1707_v2  ;;  %v1755_v2 = vld [vmem:[#allocation2 + $0x248] ss:$16 sps:$4 sm:$0xff]  }
  0x6b   :  { %924 = vmatprep.subr.bf16.mxu0 %v1715_v3  ;;  %v1758_v3 = vld [vmem:[#allocation2 + $0x28] ss:$16 sps:$4 sm:$0xff]  }
  0x6e   :  { %925 = vmatpush2.bf16.msra.mxu0 %v1713_v6  ;;  %v1766_v6 = vld [vmem:[#allocation2 + $0xc] ss:$16 sps:$4 sm:$0xff]  }
  0x6f   :  { %926 = vmatprep.subr.bf16.mxu0 %v1721_v8  ;;  %v1764_v8 = vld [vmem:[#allocation2 + $0x8] ss:$16 sps:$4 sm:$0xff]  }
  0x72   :  { %927 = vmatpush2.bf16.msra.mxu0 %v1719_v10  ;;  %v1772_v10 = vld [vmem:[#allocation2 + $0x1ec] ss:$16 sps:$4 sm:$0xff]  }
  0x73   :  { %1019 = vmatprep.subr.bf16.mxu0 %v1727_v11  ;;  %v1767_v11 = vld [vmem:[#allocation2 + $0x208] ss:$16 sps:$4 sm:$0xff]  }
  0xeb   :  { %v189_v18 = vpop.f32.mrf.mxu1 }
  0xec   :  { %v148_v20 = vpop.f32.mrf.mxu0  ;;  %v190_v21 = vadd.f32 %v189_v18, %v88_v16  ;;  %v1775_v16 = vld [vmem:[#allocation2 + $0x1cc] ss:$16 sps:$4 sm:$0xff]   ;;  %v1773_v18 = vld [vmem:[#allocation2 + $0x1c8] ss:$16 sps:$4 sm:$0xff]  }
  0xed   :  { %v149_v22 = vadd.f32 %v148_v20, %v80_v17  ;;  %v1633_v23 = vpop.f32.mrf.mxu1  ;;  %v1794_v17 = vld [vmem:[#allocation6 + $0x78] sm:$0xff]  }
  0xee   :  { %v197_v24 = vmax.f32 %v190_v21, 0.0  ;;  %v150_v25 = vpop.f32.mrf.mxu0  ;;  %v1778_v20 = vld [vmem:[#allocation2 + $0x1ac] ss:$16 sps:$4 sm:$0xff]   ;;  %v1796_v21 = vld [vmem:[#allocation6 + $0x70] sm:$0xff]  }
  0xef   :  { %v195_v26 = vmax.f32 %v149_v22, 0.0  ;;  %v151_v27 = vadd.f32 %v150_v25, %v84_v19  ;;  %v192_v28 = vpop.f32.mrf.mxu1  ;;  %v1795_v19 = vld [vmem:[#allocation6 + $0x38] sm:$0xff]   ;;  %v1776_v22 = vld [vmem:[#allocation2 + $0x1a8] ss:$16 sps:$4 sm:$0xff]   ;;  %v1798_v25 = vld [vmem:[#allocation6 + $0x68] sm:$0xff]  }
  0xf0   :  { %v1998_v30 = vpack.c.bf16 %v197_v24, %v197_v24  ;;  %v152_v32 = vpop.f32.mrf.mxu0  ;;  %v1797_v23 = vld [vmem:[#allocation6 + $0x30] sm:$0xff]   ;;  %v1781_v24 = vld [vmem:[#allocation2 + $0x18c] ss:$16 sps:$4 sm:$0xff]  }
  0xf1   :  { %v196_v33 = vmax.f32 %v151_v27, 0.0  ;;  %v1634_v34 = vpop.f32.mrf.mxu1  ;;  %v2000_v35 = vpack.c.bf16 %v195_v26, %v195_v26  ;;  %v1779_v26 = vld [vmem:[#allocation2 + $0x188] ss:$16 sps:$4 sm:$0xff]   ;;  %v1799_v27 = vld [vmem:[#allocation6 + $0x28] sm:$0xff]  }
  0xf2   :  { %970 = vmatmul.mubr.bf16.vlgmr.msra.gmra.mxu1 %v1998_v30  ;;  %v153_v36 = vpop.f32.mrf.mxu0  ;;  %v1784_v28 = vld [vmem:[#allocation2 + $0x16c] ss:$16 sps:$4 sm:$0xff]  }
  0xf3   :  { %v199_v37 = vpack.c.bf16 %v196_v33, %v196_v33  ;;  %979 = vmatpush1.bf16.msra.mxu1 %v1722_v29  ;;  %v1800_v29 = vld [vmem:[#allocation6 + $0x60] sm:$0xff]   ;;  %v1787_v32 = vld [vmem:[#allocation2 + $0x14c] ss:$16 sps:$4 sm:$0xff]  }
  0xf4   :  { %980 = vmatprep.subr.bf16.mxu1 %v1730_v31  ;;  %v1782_v31 = vld [vmem:[#allocation2 + $0x168] ss:$16 sps:$4 sm:$0xff]   ;;  %v1790_v34 = vld [vmem:[#allocation2 + $0x12c] ss:$16 sps:$4 sm:$0xff]  }
  0xf5   :  { %v2003_v40 = vpop.f32.mrf.mxu1  ;;  %v2005_v43 = vpop.f32.mrf.mxu0  ;;  %928 = vmatprep.mubr.bf16.mxu0 %v199_v37  ;;  %1010 = vmatprep.mubr.bf16.mxu1 %v199_v37  ;;  %v1785_v33 = vld [vmem:[#allocation2 + $0x148] ss:$16 sps:$4 sm:$0xff]   ;;  %v1793_v37 = vld [vmem:[#allocation2 + $0x10c] ss:$16 sps:$4 sm:$0xff]  }
  0xf6   :  { %929 = vmatmul.mubr.bf16.vlgmr.msra.gmra.mxu0 %v2000_v35  ;;  %v1788_v36 = vld [vmem:[#allocation2 + $0x128] ss:$16 sps:$4 sm:$0xff]  }
  0xf7   :  { %v2007_v44 = vpop.f32.mrf.mxu1  ;;  %v2010_v45 = vpop.f32.mrf.mxu0  ;;  %1020 = vmatpush1.bf16.msra.mxu0 %v1725_v38  ;;  %981 = vmatpush1.bf16.msra.mxu1 %v1728_v39  ;;  %v1791_v38 = vld [vmem:[#allocation2 + $0x108] ss:$16 sps:$4 sm:$0xff]   ;;  %v1802_v39 = vld [vmem:[#allocation6 + $0x58] sm:$0xff]  }
  0xf8   :  { %1021 = vmatprep.subr.bf16.mxu0 %v1733_v41  ;;  %982 = vmatprep.subr.bf16.mxu1 %v1736_v42  ;;  %v1803_v41 = vld [vmem:[#allocation6 + $0x18] sm:$0xff]   ;;  %v1804_v42 = vld [vmem:[#allocation6 + $0x50] sm:$0xff]  }
  0xf9   :  { %v413_v48 = vpop.f32.mrf.mxu1  ;;  %v372_v51 = vpop.f32.mrf.mxu0  ;;  %1051 = vmatprep.mubr.bf16.mxu0 %v1898_v1  ;;  %v1749_v1 = vld [vmem:[#allocation2 + $0x268] ss:$16 sps:$4 sm:$0xff]  }
  0xfa   :  { %v1807_v48 = vld [vmem:[#allocation6 + $0x8] sm:$0xff]   ;;  %v1810_v51 = vld [vmem:[#allocation6 + $0xf8] sm:$0xff]  }
  0xfb   :  { %v414_v52 = vpop.f32.mrf.mxu1  ;;  %v373_v53 = vpop.f32.mrf.mxu0  ;;  %1022 = vmatpush1.bf16.msra.mxu0 %v1731_v46  ;;  %983 = vmatpush1.bf16.msra.mxu1 %v1734_v47  ;;  %v1805_v46 = vld [vmem:[#allocation6 + $0x10] sm:$0xff]   ;;  %v1806_v47 = vld [vmem:[#allocation6 + $0x48] sm:$0xff]  }
  0xfc   :  { %1023 = vmatprep.subr.bf16.mxu0 %v1739_v49  ;;  %984 = vmatprep.subr.bf16.mxu1 %v1742_v50  ;;  %v1808_v49 = vld [vmem:[#allocation6 + $0x40] sm:$0xff]   ;;  %v1811_v52 = vld [vmem:[#allocation6 + $0xb8] sm:$0xff]   ;;  %v1812_v53 = vld [vmem:[#allocation6 + $0xf0] sm:$0xff]  }
  0xfd   :  { %v1809_v50 = vld [vmem:[#allocation6] sm:$0xff]  }
  0xff   :  { %1024 = vmatpush1.bf16.msra.mxu0 %v1737_v54  ;;  %985 = vmatpush1.bf16.msra.mxu1 %v1740_v55  ;;  %v1814_v54 = vld [vmem:[#allocation6 + $0xe8] sm:$0xff]  }
 0x100   :  { %1025 = vmatprep.subr.bf16.mxu0 %v1745_v56  ;;  %986 = vmatprep.subr.bf16.mxu1 %v1748_v57  ;;  %v1815_v55 = vld [vmem:[#allocation6 + $0xa8] sm:$0xff]   ;;  %v1816_v56 = vld [vmem:[#allocation6 + $0xe0] sm:$0xff]  }
 0x101   :  { %v1817_v57 = vld [vmem:[#allocation6 + $0xa0] sm:$0xff]  }
 0x103   :  { %1026 = vmatpush1.bf16.msra.mxu0 %v1743_v58  ;;  %987 = vmatpush1.bf16.msra.mxu1 %v1746_v59  ;;  %v1818_v58 = vld [vmem:[#allocation6 + $0xd8] sm:$0xff]  }
 0x104   :  { %1027 = vmatprep.subr.bf16.mxu0 %v1751_v60  ;;  %988 = vmatprep.subr.bf16.mxu1 %v1754_v61  ;;  %v1819_v59 = vld [vmem:[#allocation6 + $0x98] sm:$0xff]   ;;  %v1820_v60 = vld [vmem:[#allocation6 + $0xd0] sm:$0xff]  }
 0x105   :  { %v1821_v61 = vld [vmem:[#allocation6 + $0x90] sm:$0xff]  }
 0x107   :  { %1028 = vmatpush1.bf16.msra.mxu0 %v1749_v1  ;;  %989 = vmatpush1.bf16.msra.mxu1 %v1752_v62  ;;  %v1822_v1 = vld [vmem:[#allocation6 + $0xc8] sm:$0xff]  }
 0x108   :  { %1029 = vmatprep.subr.bf16.mxu0 %v1757_v63  ;;  %990 = vmatprep.subr.bf16.mxu1 %v1760_v0  ;;  %v1823_v62 = vld [vmem:[#allocation6 + $0x88] sm:$0xff]   ;;  %v1824_v63 = vld [vmem:[#allocation6 + $0xc0] sm:$0xff]  }
 0x109   :  { %v1825_v0 = vld [vmem:[#allocation6 + $0x80] sm:$0xff]  }
 0x10b   :  { %1030 = vmatpush1.bf16.msra.mxu0 %v1755_v2  ;;  %991 = vmatpush1.bf16.msra.mxu1 %v1758_v3 }
 0x10c   :  { %1031 = vmatprep.subr.bf16.mxu0 %v1763_v4  ;;  %992 = vmatprep.subr.bf16.mxu1 %v1766_v6  ;;  %v1060_v4 = vld [vmem:[#allocation4] sm:$0xf] }
 0x10f   :  { %1032 = vmatpush1.bf16.msra.mxu0 %v1761_v7  ;;  %993 = vmatpush1.bf16.msra.mxu1 %v1764_v8 }
 0x110   :  { %1033 = vmatprep.subr.bf16.mxu0 %v1769_v9  ;;  %994 = vmatprep.subr.bf16.mxu1 %v1772_v10  ;;  %v1065_v9 = vrot.slane %v1060_v4, %v79_v14 }
 0x113   :  { %1034 = vmatpush1.bf16.msra.mxu0 %v1767_v11  ;;  %995 = vmatpush2.bf16.msra.mxu1 %v1770_v13 }
 0x114   :  { %996 = vmatprep.subr.bf16.mxu1 %v1775_v16  ;;  %1585 = vmatprep.subr.bf16.mxu0 %v1794_v17  ;;  %v1069_v17 = vrot.slane %v1060_v4, %v83_v15 }
 0x116   :  { %1052 = vmatmul.mubr.bf16.vlgmr.msra.gmra.mxu0 %v1998_v30  ;;  %v1801_v30 = vld [vmem:[#allocation6 + $0x20] sm:$0xff]  }
 0x117   :  { %997 = vmatpush2.bf16.msra.mxu1 %v1773_v18  ;;  %1586 = vmatpush3.bf16.msra.mxu0 %v1795_v19 }
 0x118   :  { %998 = vmatprep.subr.bf16.mxu1 %v1778_v20  ;;  %1587 = vmatprep.subr.bf16.mxu0 %v1796_v21 }
 0x11b   :  { %999 = vmatpush2.bf16.msra.mxu1 %v1776_v22  ;;  %1588 = vmatpush3.bf16.msra.mxu0 %v1797_v23 }
 0x11c   :  { %1000 = vmatprep.subr.bf16.mxu1 %v1781_v24  ;;  %1589 = vmatprep.subr.bf16.mxu0 %v1798_v25 }
 0x11f   :  { %1001 = vmatpush2.bf16.msra.mxu1 %v1779_v26  ;;  %1590 = vmatpush3.bf16.msra.mxu0 %v1799_v27 }
 0x120   :  { %1002 = vmatprep.subr.bf16.mxu1 %v1784_v28  ;;  %1591 = vmatprep.subr.bf16.mxu0 %v1800_v29 }
 0x123   :  { %1003 = vmatpush2.bf16.msra.mxu1 %v1782_v31  ;;  %1592 = vmatpush3.bf16.msra.mxu0 %v1801_v30  ;;  %v1073_v31 = vrot.slane %v1060_v4, %v87_v12 }
 0x124   :  { %1004 = vmatprep.subr.bf16.mxu1 %v1787_v32  ;;  %1593 = vmatprep.subr.bf16.mxu0 %v1802_v39 }
 0x127   :  { %1005 = vmatpush2.bf16.msra.mxu1 %v1785_v33  ;;  %1594 = vmatpush3.bf16.msra.mxu0 %v1803_v41 }
 0x128   :  { %1006 = vmatprep.subr.bf16.mxu1 %v1790_v34  ;;  %1595 = vmatprep.subr.bf16.mxu0 %v1804_v42 }
 0x12b   :  { %1007 = vmatpush2.bf16.msra.mxu1 %v1788_v36  ;;  %1596 = vmatpush3.bf16.msra.mxu0 %v1805_v46 }
 0x12c   :  { %1008 = vmatprep.subr.bf16.mxu1 %v1793_v37  ;;  %1597 = vmatprep.subr.bf16.mxu0 %v1806_v47 }
 0x12f   :  { %1009 = vmatpush2.bf16.msra.mxu1 %v1791_v38  ;;  %1598 = vmatpush3.bf16.msra.mxu0 %v1807_v48 }
 0x130   :  { %1599 = vmatprep.subr.bf16.mxu0 %v1808_v49  ;;  %1607 = vmatprep.subr.bf16.mxu1 %v1810_v51 }
 0x132   :  { %1011 = vmatmul.mubr.bf16.vlgmr.msra.gmra.mxu1 %v2000_v35  ;;  %v1813_v35 = vld [vmem:[#allocation6 + $0xb0] sm:$0xff]  }
 0x133   :  { %1600 = vmatpush3.bf16.msra.mxu0 %v1809_v50  ;;  %1608 = vmatpush3.bf16.msra.mxu1 %v1811_v52 }
 0x134   :  { %1609 = vmatprep.subr.bf16.mxu1 %v1812_v53 }
 0x137   :  { %1610 = vmatpush3.bf16.msra.mxu1 %v1813_v35 }
 0x138   :  { %1611 = vmatprep.subr.bf16.mxu1 %v1814_v54 }
 0x13b   :  { %1612 = vmatpush3.bf16.msra.mxu1 %v1815_v55 }
 0x13c   :  { %1613 = vmatprep.subr.bf16.mxu1 %v1816_v56 }
 0x13f   :  { %1614 = vmatpush3.bf16.msra.mxu1 %v1817_v57 }
 0x140   :  { %1615 = vmatprep.subr.bf16.mxu1 %v1818_v58 }
 0x143   :  { %1616 = vmatpush3.bf16.msra.mxu1 %v1819_v59 }
 0x144   :  { %1617 = vmatprep.subr.bf16.mxu1 %v1820_v60 }
 0x147   :  { %1618 = vmatpush3.bf16.msra.mxu1 %v1821_v61 }
 0x148   :  { %1619 = vmatprep.subr.bf16.mxu1 %v1822_v1 }
 0x14b   :  { %1620 = vmatpush3.bf16.msra.mxu1 %v1823_v62 }
 0x14c   :  { %1621 = vmatprep.subr.bf16.mxu1 %v1824_v63 }
 0x14f   :  { %1622 = vmatpush3.bf16.msra.mxu1 %v1825_v0 }
 0x1b2   :  { %v971_v2 = vpop.f32.mrf.mxu1 }
 0x1b4   :  { %v973_v3 = vpop.f32.mrf.mxu1 }
 0x1b6   :  { %v930_v6 = vpop.f32.mrf.mxu0  ;;  %v975_v7 = vpop.f32.mrf.mxu1 }
 0x1b7   :  { %v931_v8 = vadd.f32 %v930_v6, %v2005_v43 }
 0x1b8   :  { %v932_v10 = vpop.f32.mrf.mxu0  ;;  %v976_v11 = vpop.f32.mrf.mxu1 }
 0x1b9   :  { %v972_v13 = vadd.f32 %v971_v2, %v931_v8  ;;  %v933_v16 = vadd.f32 %v932_v10, %v2010_v45  ;;  %v1076_v45 = vsub.s32 3, %v1961_v5 }
 0x1ba   :  { %v934_v18 = vpop.f32.mrf.mxu0 }
 0x1bb   :  { %v1082_v19 = vadd.f32 %v1065_v9, %v972_v13  ;;  %v974_v20 = vadd.f32 %v973_v3, %v933_v16  ;;  %v1077_v34 = vrot.slane %v1060_v4, %v1076_v45 }
 0x1bc   :  { %v935_v21 = vpop.f32.mrf.mxu0 }
 0x1bd   :  { %v1083_v22 = vadd.f32 %v1069_v17, %v974_v20  ;;  %v1086_v23 = vmax.f32 %v1082_v19, 0.0 }
 0x1bf   :  { %v1087_v24 = vmax.f32 %v1083_v22, 0.0  ;;  %v1090_v43 = vpack.c.bf16 %v1086_v23, %v1086_v23 }
 0x1c1   :  { %v1091_v25 = vpack.c.bf16 %v1087_v24, %v1087_v24 }
 0x1c3   :  { %1389 = vmatprep.mubr.bf16.mxu0 %v1091_v25 }
 0x1c4   :  { %1390 = vmatmul.mubr.bf16.vlgmr.msra.gmra.mxu0 %v1090_v43 }
 0x1d6   :  { %v1053_v14 = vpop.f32.mrf.mxu0 }
 0x1d8   :  { %v1055_v26 = vpop.f32.mrf.mxu0 }
 0x1da   :  { %v1057_v27 = vpop.f32.mrf.mxu0 }
 0x1dc   :  { %v1058_v28 = vpop.f32.mrf.mxu0 }
 0x1f2   :  { %v1012_v29 = vpop.f32.mrf.mxu1 }
 0x1f3   :  { %v1013_v15 = vadd.f32 %v1012_v29, %v2003_v40 }
 0x1f4   :  { %v1014_v30 = vpop.f32.mrf.mxu1 }
 0x1f5   :  { %v1054_v32 = vadd.f32 %v1053_v14, %v1013_v15  ;;  %v1015_v33 = vadd.f32 %v1014_v30, %v2007_v44  ;;  %v1550_v44 = vld [vmem:[%s2040_s8] ss:$0 sm:$0xff] }
 0x1f6   :  { %v1016_v36 = vpop.f32.mrf.mxu1 }
 0x1f7   :  { %v1084_v37 = vadd.f32 %v1073_v31, %v1054_v32  ;;  %v1056_v38 = vadd.f32 %v1055_v26, %v1015_v33 }
 0x1f8   :  { %v1017_v39 = vpop.f32.mrf.mxu1 }
 0x1f9   :  { %v1085_v41 = vadd.f32 %v1077_v34, %v1056_v38  ;;  %v1088_v42 = vmax.f32 %v1084_v37, 0.0 }
 0x1fb   :  { %v1089_v46 = vmax.f32 %v1085_v41, 0.0  ;;  %v1092_v48 = vpack.c.bf16 %v1088_v42, %v1088_v42 }
 0x1fd   :  { %v1093_v47 = vpack.c.bf16 %v1089_v46, %v1089_v46 }
 0x1ff   :  { %1429 = vmatprep.mubr.bf16.mxu1 %v1093_v47 }
 0x200   :  { %1430 = vmatmul.mubr.bf16.vlgmr.msra.gmra.mxu1 %v1092_v48 }
 0x284   :  { %v1601_v40 = vpop.f32.mrf.mxu0 }
 0x286   :  { %v1602_v49 = vpop.f32.mrf.mxu0 }
 0x287   :  { %v1603_v50 = vadd.f32 %v1602_v49, %v1601_v40 }
 0x288   :  { %v1604_v5 = vpop.f32.mrf.mxu0 }
 0x289   :  { %v1392_v53 = vadd.f32 %v1603_v50, %v1550_v44 }
 0x28a   :  { %v1605_v12 = vpop.f32.mrf.mxu0 }
 0x2c0   :  { %v1623_v51 = vpop.f32.mrf.mxu1 }
 0x2c2   :  { %v1624_v52 = vpop.f32.mrf.mxu1 }
 0x2c3   :  { %v1625_v35 = vadd.f32 %v1624_v52, %v1623_v51 }
 0x2c4   :  { %v1626_v54 = vpop.f32.mrf.mxu1 }
 0x2c5   :  { %v1432_v55 = vadd.f32 %v1625_v35, %v1392_v53 }
 0x2c6   :  { %v1627_v56 = vpop.f32.mrf.mxu1 }
 0x2c7   :  { %1437 = vst [vmem:[%s2041_s9] sm:$0xff] %v1432_v55 }
 0x2c8   :  { %1442 = vsyncpa [#allocation3], 1 }
 0x2c9   :  { %1443 = vsyncpa [#allocation5], 1 }

</bundles_post_ra>
